<compile_context>
chip_gen: v6e
topology: v6e:2x2x1
jax: 0.10.0
libtpu: 0.0.40
codegen_flags: <defaults>
</compile_context>

<pallas_src>
import jax
import jax.numpy as jnp
from jax.experimental import pallas as pl
from jax.experimental.pallas import tpu as pltpu

# Reference has no epsilon (it would NaN on zero-norm rows); _EPS keeps zero-norm
# rows and ragged-block garbage finite. Deliberate, documented semantic difference.
_EPS = 1e-12


def _make_triplet_kernel(total_b: int, tb: int):
    def kernel(margin_ref, a_ref, p_ref, n_ref, out_ref):
        # Upcast in-register; inputs arrive in their native HBM dtype.
        a = a_ref[...].astype(jnp.float32)   # (tb, M, D)
        p = p_ref[...].astype(jnp.float32)   # (tb, M, D)
        n = n_ref[...].astype(jnp.float32)   # (tb, N, D)

        # Row-normalise with rsqrt (EUP slot, co-issues for free).
        inv_a = jax.lax.rsqrt(jnp.sum(a * a, axis=-1, keepdims=True) + _EPS)
        inv_p = jax.lax.rsqrt(jnp.sum(p * p, axis=-1, keepdims=True) + _EPS)
        inv_n = jax.lax.rsqrt(jnp.sum(n * n, axis=-1, keepdims=True) + _EPS)

        # Mean unit vector per batch: (tb, D)
        a_bar = jnp.mean(a * inv_a, axis=1)
        p_bar = jnp.mean(p * inv_p, axis=1)
        n_bar = jnp.mean(n * inv_n, axis=1)

        # mean pairwise cosine == dot of mean unit vectors (exact identity)
        mean_ap = jnp.sum(a_bar * p_bar, axis=-1, keepdims=True)  # (tb, 1)
        mean_an = jnp.sum(a_bar * n_bar, axis=-1, keepdims=True)  # (tb, 1)

        margin = margin_ref[...].astype(jnp.float32)               # (tb, 1)
        # (1-mean_ap) - (1-mean_an) + margin  ==  mean_an - mean_ap + margin
        hinge = jnp.maximum(mean_an - mean_ap + margin, 0.0)

        # Ragged last block (no HBM padding): rows with global index >= total_b
        # hold unspecified data; select() does not propagate their NaN/Inf and
        # Pallas drops their writeback anyway. Compute is hidden under the DMA.
        batch_idx = (pl.program_id(0) * tb
                     + jax.lax.broadcasted_iota(jnp.int32, (tb, 1), 0))
        out_ref[...] = jnp.where(batch_idx < total_b, hinge, 0.0)

    return kernel


def triplet_loss(a_emb, p_emb, n_emb, margin_vec, *, batch_size, return_examples,
                 p_n_ratio, emb_dim=512):
    B, M, D = batch_size, return_examples, emb_dim
    N = return_examples * p_n_ratio

    # Reshape only (layout metadata). Keep native HBM dtype: no casts, no pads.
    a3 = a_emb.reshape(B, M, D)
    p3 = p_emb.reshape(B, M, D)
    n3 = n_emb.reshape(B, N, D)
    margin2 = margin_vec.reshape(B, 1).astype(jnp.float32)

    # Batch tile per grid step. ~12 MiB/step (double-buffered ~24 MiB, fits under
    # the 48 MiB VMEM limit) amortises the ~0.35us/step pipeline overhead; capped
    # near B/2 so the "parallel" axis has >= 2 blocks for v7x megacore when B>=16.
    per_b_bytes = (M * (a3.dtype.itemsize + p3.dtype.itemsize)
                   + N * n3.dtype.itemsize) * D
    tb = max(1, min(B, (12 << 20) // max(per_b_bytes, 1)))
    if B >= 16:
        tb = min(tb, pl.cdiv(B, 2))
        # (tb, 1) margin/output blocks: sublane dim must be a multiple of 8
        # whenever tb < B.
        tb = max(8, (tb // 8) * 8)
    else:
        tb = B  # single block; block dims equal full array dims
    num_blocks = pl.cdiv(B, tb)

    per_batch_loss = pl.pallas_call(
        _make_triplet_kernel(B, tb),
        out_shape=jax.ShapeDtypeStruct((B, 1), jnp.float32),
        grid_spec=pltpu.PrefetchScalarGridSpec(
            num_scalar_prefetch=0,
            grid=(num_blocks,),
            in_specs=[
                pl.BlockSpec((tb, 1), lambda i: (i, 0)),        # margins
                pl.BlockSpec((tb, M, D), lambda i: (i, 0, 0)),  # anchors
                pl.BlockSpec((tb, M, D), lambda i: (i, 0, 0)),  # positives
                pl.BlockSpec((tb, N, D), lambda i: (i, 0, 0)),  # negatives
            ],
            out_specs=pl.BlockSpec((tb, 1), lambda i: (i, 0)),  # per-batch losses
        ),
        compiler_params=pltpu.CompilerParams(
            dimension_semantics=("parallel",),   # disjoint output blocks -> safe
            vmem_limit_bytes=48 << 20,           # headroom under v7x 64 MiB VMEM
        ),
    )(margin2, a3, p3, n3)

    # Output volume is ~4 B/batch (negligible vs. input stream); final reduce in XLA.
    return jnp.sum(per_batch_loss)


def _reference(a_emb, p_emb, n_emb, margin_vec, *, batch_size, return_examples,
               p_n_ratio, emb_dim=512):
    B, M, D = batch_size, return_examples, emb_dim
    N = return_examples * p_n_ratio
    a3 = a_emb.reshape(B, M, D).astype(jnp.float32)
    p3 = p_emb.reshape(B, M, D).astype(jnp.float32)
    n3 = n_emb.reshape(B, N, D).astype(jnp.float32)

    def cosim(x, y):
        nx = jnp.linalg.norm(x, axis=-1)[..., :, None]
        ny = jnp.linalg.norm(y, axis=-1)[..., None, :]
        dot = jnp.einsum("bmd,bnd->bmn", x, y)
        return 1.0 - jnp.mean(dot / (nx * ny), axis=(1, 2))

    sim_ap = cosim(a3, p3)
    sim_an = cosim(a3, n3)
    tl = sim_ap - sim_an + margin_vec
    return jnp.sum(jnp.maximum(tl, 0.0))


if __name__ == "__main__":
    D = 512  # module hard-codes 512 in its reshapes

    def run_case(batch_size, return_examples, p_n_ratio, margin=0.9):
        key = jax.random.PRNGKey(0)
        ka, kp, kn = jax.random.split(key, 3)
        a_emb = jax.random.normal(ka, (batch_size * return_examples, D),
                                  dtype=jnp.float32)
        p_emb = jax.random.normal(kp, (batch_size * return_examples, D),
                                  dtype=jnp.float32)
        n_emb = jax.random.normal(kn, (batch_size * return_examples * p_n_ratio, D),
                                  dtype=jnp.float32)
        margin_vec = jnp.full((batch_size,), margin, dtype=jnp.float32)

        out = triplet_loss(a_emb, p_emb, n_emb, margin_vec,
                           batch_size=batch_size, return_examples=return_examples,
                           p_n_ratio=p_n_ratio, emb_dim=D)
        out = jax.block_until_ready(out)

        ref = _reference(a_emb, p_emb, n_emb, margin_vec,
                         batch_size=batch_size, return_examples=return_examples,
                         p_n_ratio=p_n_ratio, emb_dim=D)
        assert jnp.allclose(out, ref, atol=1e-4, rtol=1e-4), (out, ref)

    # Module-consistent small case (single grid block, tb == B).
    run_case(batch_size=2, return_examples=8, p_n_ratio=4)
    # Multi-block + ragged-last-block case (exercises the no-padding mask path).
    run_case(batch_size=20, return_examples=8, p_n_ratio=4)

    print("KERNEL_OK")
</pallas_src>

<mosaic_0001>
module attributes {stable_mosaic.version = 11 : i64} {
  func.func @kernel(%arg0: i32, %arg1: memref<2x1xf32, #tpu.memory_space<vmem>>, %arg2: memref<2x8x512xf32, #tpu.memory_space<vmem>>, %arg3: memref<2x8x512xf32, #tpu.memory_space<vmem>>, %arg4: memref<2x32x512xf32, #tpu.memory_space<vmem>>, %arg5: memref<2x1xf32, #tpu.memory_space<vmem>>) attributes {dimension_semantics = [#tpu.dimension_semantics<parallel>], iteration_bounds = array<i64: 1>, scalar_prefetch = 0 : i64, scratch_operands = 0 : i64, tpu.core_type = #tpu.core_type<tc>, window_params = [{transform_indices = @transform_0, window_bounds = array<i64: 2, 1>}, {transform_indices = @transform_1, window_bounds = array<i64: 2, 8, 512>}, {transform_indices = @transform_2, window_bounds = array<i64: 2, 8, 512>}, {transform_indices = @transform_3, window_bounds = array<i64: 2, 32, 512>}, {transform_indices = @transform_4, window_bounds = array<i64: 2, 1>}]} {
    %c0 = arith.constant 0 : index
    %c0_0 = arith.constant 0 : index
    %c0_1 = arith.constant 0 : index
    %0 = vector.load %arg2[%c0, %c0_0, %c0_1] : memref<2x8x512xf32, #tpu.memory_space<vmem>>, vector<2x8x512xf32>
    %c0_2 = arith.constant 0 : index
    %c0_3 = arith.constant 0 : index
    %c0_4 = arith.constant 0 : index
    %1 = vector.load %arg3[%c0_2, %c0_3, %c0_4] : memref<2x8x512xf32, #tpu.memory_space<vmem>>, vector<2x8x512xf32>
    %c0_5 = arith.constant 0 : index
    %c0_6 = arith.constant 0 : index
    %c0_7 = arith.constant 0 : index
    %2 = vector.load %arg4[%c0_5, %c0_6, %c0_7] : memref<2x32x512xf32, #tpu.memory_space<vmem>>, vector<2x32x512xf32>
    %3 = arith.mulf %0, %0 : vector<2x8x512xf32>
    %cst = arith.constant dense<0.000000e+00> : vector<2x8xf32>
    %4 = vector.multi_reduction <add>, %3, %cst [2] : vector<2x8x512xf32> to vector<2x8xf32>
    %5 = vector.shape_cast %4 : vector<2x8xf32> to vector<2x8x1xf32>
    %cst_8 = arith.constant 9.99999996E-13 : f32
    %6 = vector.broadcast %cst_8 : f32 to vector<2x8x1xf32>
    %7 = arith.addf %5, %6 : vector<2x8x1xf32>
    %8 = math.rsqrt %7 : vector<2x8x1xf32>
    %9 = arith.mulf %1, %1 : vector<2x8x512xf32>
    %cst_9 = arith.constant dense<0.000000e+00> : vector<2x8xf32>
    %10 = vector.multi_reduction <add>, %9, %cst_9 [2] : vector<2x8x512xf32> to vector<2x8xf32>
    %11 = vector.shape_cast %10 : vector<2x8xf32> to vector<2x8x1xf32>
    %cst_10 = arith.constant 9.99999996E-13 : f32
    %12 = vector.broadcast %cst_10 : f32 to vector<2x8x1xf32>
    %13 = arith.addf %11, %12 : vector<2x8x1xf32>
    %14 = math.rsqrt %13 : vector<2x8x1xf32>
    %15 = arith.mulf %2, %2 : vector<2x32x512xf32>
    %cst_11 = arith.constant dense<0.000000e+00> : vector<2x32xf32>
    %16 = vector.multi_reduction <add>, %15, %cst_11 [2] : vector<2x32x512xf32> to vector<2x32xf32>
    %17 = vector.shape_cast %16 : vector<2x32xf32> to vector<2x32x1xf32>
    %cst_12 = arith.constant 9.99999996E-13 : f32
    %18 = vector.broadcast %cst_12 : f32 to vector<2x32x1xf32>
    %19 = arith.addf %17, %18 : vector<2x32x1xf32>
    %20 = math.rsqrt %19 : vector<2x32x1xf32>
    %21 = vector.broadcast %8 : vector<2x8x1xf32> to vector<2x8x512xf32>
    %22 = arith.mulf %0, %21 : vector<2x8x512xf32>
    %cst_13 = arith.constant dense<0.000000e+00> : vector<2x512xf32>
    %23 = vector.multi_reduction <add>, %22, %cst_13 [1] : vector<2x8x512xf32> to vector<2x512xf32>
    %cst_14 = arith.constant 8.000000e+00 : f32
    %24 = vector.broadcast %cst_14 : f32 to vector<2x512xf32>
    %25 = arith.divf %23, %24 : vector<2x512xf32>
    %26 = vector.broadcast %14 : vector<2x8x1xf32> to vector<2x8x512xf32>
    %27 = arith.mulf %1, %26 : vector<2x8x512xf32>
    %cst_15 = arith.constant dense<0.000000e+00> : vector<2x512xf32>
    %28 = vector.multi_reduction <add>, %27, %cst_15 [1] : vector<2x8x512xf32> to vector<2x512xf32>
    %cst_16 = arith.constant 8.000000e+00 : f32
    %29 = vector.broadcast %cst_16 : f32 to vector<2x512xf32>
    %30 = arith.divf %28, %29 : vector<2x512xf32>
    %31 = vector.broadcast %20 : vector<2x32x1xf32> to vector<2x32x512xf32>
    %32 = arith.mulf %2, %31 : vector<2x32x512xf32>
    %cst_17 = arith.constant dense<0.000000e+00> : vector<2x512xf32>
    %33 = vector.multi_reduction <add>, %32, %cst_17 [1] : vector<2x32x512xf32> to vector<2x512xf32>
    %cst_18 = arith.constant 3.200000e+01 : f32
    %34 = vector.broadcast %cst_18 : f32 to vector<2x512xf32>
    %35 = arith.divf %33, %34 : vector<2x512xf32>
    %36 = arith.mulf %25, %30 : vector<2x512xf32>
    %cst_19 = arith.constant dense<0.000000e+00> : vector<2xf32>
    %37 = vector.multi_reduction <add>, %36, %cst_19 [1] : vector<2x512xf32> to vector<2xf32>
    %38 = vector.shape_cast %37 : vector<2xf32> to vector<2x1xf32>
    %39 = arith.mulf %25, %35 : vector<2x512xf32>
    %cst_20 = arith.constant dense<0.000000e+00> : vector<2xf32>
    %40 = vector.multi_reduction <add>, %39, %cst_20 [1] : vector<2x512xf32> to vector<2xf32>
    %41 = vector.shape_cast %40 : vector<2xf32> to vector<2x1xf32>
    %c0_21 = arith.constant 0 : index
    %c0_22 = arith.constant 0 : index
    %42 = vector.load %arg1[%c0_21, %c0_22] : memref<2x1xf32, #tpu.memory_space<vmem>>, vector<2x1xf32>
    %43 = arith.subf %41, %38 : vector<2x1xf32>
    %44 = arith.addf %43, %42 : vector<2x1xf32>
    %cst_23 = arith.constant 0.000000e+00 : f32
    %45 = vector.broadcast %cst_23 : f32 to vector<2x1xf32>
    %46 = arith.maximumf %44, %45 : vector<2x1xf32>
    %c2_i32 = arith.constant 2 : i32
    %47 = arith.muli %arg0, %c2_i32 : i32
    %48 = tpu.iota {dimensions = array<i32: 0>} : vector<2x1xi32>
    %49 = vector.broadcast %47 : i32 to vector<2x1xi32>
    %50 = arith.addi %49, %48 : vector<2x1xi32>
    %c2_i32_24 = arith.constant 2 : i32
    %51 = vector.broadcast %c2_i32_24 : i32 to vector<2x1xi32>
    %52 = arith.cmpi slt, %50, %51 : vector<2x1xi32>
    %cst_25 = arith.constant 0.000000e+00 : f32
    %53 = vector.broadcast %cst_25 : f32 to vector<2x1xf32>
    %54 = arith.select %52, %46, %53 : vector<2x1xi1>, vector<2x1xf32>
    %c0_26 = arith.constant 0 : index
    %c0_27 = arith.constant 0 : index
    %55 = vector.load %arg5[%c0_26, %c0_27] : memref<2x1xf32, #tpu.memory_space<vmem>>, vector<2x1xf32>
    tpu.vector_store %arg5[%c0_26, %c0_27], %54 {strides = array<i32>} : memref<2x1xf32, #tpu.memory_space<vmem>>, vector<2x1xf32>,
    return
  }
  func.func @transform_0(%arg0: i32) -> (i32, i32) {
    %c0_i32 = arith.constant 0 : i32
    %c0_i32_0 = arith.constant 0 : i32
    return %arg0, %c0_i32 : i32, i32
  }
  func.func @transform_1(%arg0: i32) -> (i32, i32, i32) {
    %c0_i32 = arith.constant 0 : i32
    %c0_i32_0 = arith.constant 0 : i32
    %c0_i32_1 = arith.constant 0 : i32
    return %arg0, %c0_i32, %c0_i32_0 : i32, i32, i32
  }
  func.func @transform_2(%arg0: i32) -> (i32, i32, i32) {
    %c0_i32 = arith.constant 0 : i32
    %c0_i32_0 = arith.constant 0 : i32
    %c0_i32_1 = arith.constant 0 : i32
    return %arg0, %c0_i32, %c0_i32_0 : i32, i32, i32
  }
  func.func @transform_3(%arg0: i32) -> (i32, i32, i32) {
    %c0_i32 = arith.constant 0 : i32
    %c0_i32_0 = arith.constant 0 : i32
    %c0_i32_1 = arith.constant 0 : i32
    return %arg0, %c0_i32, %c0_i32_0 : i32, i32, i32
  }
  func.func @transform_4(%arg0: i32) -> (i32, i32) {
    %c0_i32 = arith.constant 0 : i32
    %c0_i32_0 = arith.constant 0 : i32
    return %arg0, %c0_i32 : i32, i32
  }
}

</mosaic_0001>

<bundles_post_ra>
// kernel: tpu_custom_call.1
= control target key start
LH: loop header
LB: loop body
LE: loop exit
PB: predicated region body
PF: predicated region fallthrough
CT: control target
= control target key end

     0   :  { %9 = vsyncpa [#allocation3], 0  ;;  %s1045_s0 = inlined_call_operand.vmem [shape: f32[2,1], index: 0, kind: input, shape index: {}]   ;;  %s1046_s1 = inlined_call_operand.hbm [shape: f32[2,8,512], index: 1, kind: input, shape index: {}]   ;;  %s1047_s2 = inlined_call_operand.hbm [shape: f32[2,8,512], index: 2, kind: input, shape index: {}]   ;;  %s1048_s3 = inlined_call_operand.hbm [shape: f32[2,32,512], index: 3, kind: input, shape index: {}]   ;;  %s1049_s4 = inlined_call_operand.vmem [shape: f32[2,1], index: 4, kind: output, shape index: {}]  }
   0x1   :  { %10 = vsyncpa [#allocation5], 0  ;;  %s660_s15 = smov [#allocation4]   ;;  %s661_s17 = smov [#allocation2]  }
   0x2   :  { %s30_s16 = sshll.u32 %s660_s15, 4  ;;  %s18_s18 = sshll.u32 %s661_s17, 4  ;;  %s31_s16 = int_to_ptr.vmem [resolvable:$true] %s30_s16  ;;  %s19_s18 = int_to_ptr.vmem [resolvable:$true] %s18_s18 }
   0x3   :  { %s604_s19 = scalar_lea.vmem %s31_s16, 1024  ;;  %p609_p1 = scmp.lt.s32.totalorder %s31_s16, %s31_s16 }
   0x4   :  { %p605_p0 = scmp.ne.s32.totalorder %s31_s16, %s604_s19  ;;  %p610_p2 = scmp.lt.s32.totalorder %s604_s19, %s604_s19 }
   0x6   :  { %p611_p3 = por %p610_p2, %p609_p1 }
   0x8   :  { %p612_p4 = pnand %p611_p3, %p605_p0 }
   0xa   :  { %615 = shalt.err (!%p612_p4)
}
   0xb   :  { %s662_s20 = smov 512   ;;  %s663_s21 = smov 32  }
   0xc   :  { %36 = dma.hbm_to_vmem [thread:$0]  %s1047_s2, 1024, %s31_s16, [#allocation5], %s662_s20, %s662_s20, %s663_s21  }
   0xd   :  { %s624_s24 = scalar_lea.vmem %s19_s18, 1024  ;;  %p629_p6 = scmp.lt.s32.totalorder %s19_s18, %s19_s18 }
   0xe   :  { %p625_p5 = scmp.ne.s32.totalorder %s19_s18, %s624_s24  ;;  %p630_p7 = scmp.lt.s32.totalorder %s624_s24, %s624_s24 }
  0x10   :  { %p631_p8 = por %p630_p7, %p629_p6 }
  0x12   :  { %p632_p9 = pnand %p631_p8, %p625_p5 }
  0x14   :  { %635 = shalt.err (!%p632_p9)
}
  0x15   :  { %24 = dma.hbm_to_vmem [thread:$0]  %s1046_s1, 1024, %s19_s18, [#allocation3], %s662_s20, %s662_s20, %s663_s21  }
  0x16   :  { %s664_s27 = smov [#allocation6]  }
  0x17   :  { %s42_s28 = sshll.u32 %s664_s27, 4  ;;  %s43_s28 = int_to_ptr.vmem [resolvable:$true] %s42_s28 }
  0x18   :  { %s644_s29 = scalar_lea.vmem %s43_s28, 4096  ;;  %p649_p11 = scmp.lt.s32.totalorder %s43_s28, %s43_s28 }
  0x19   :  { %p645_p10 = scmp.ne.s32.totalorder %s43_s28, %s644_s29  ;;  %p650_p12 = scmp.lt.s32.totalorder %s644_s29, %s644_s29 }
  0x1b   :  { %p651_p13 = por %p650_p12, %p649_p11 }
  0x1d   :  { %p652_p0 = pnand %p651_p13, %p645_p10 }
  0x1f   :  { %655 = shalt.err (!%p652_p0)
}
  0x20   :  { %48 = dma.hbm_to_vmem [thread:$0]  %s1048_s3, 4096, %s43_s28, [#allocation5], %s662_s20, %s662_s20, %s663_s21  }
  0x21   :  { %656 = dma.done.wait [#allocation3], 1024  }
  0x22   :  { %657 = vsyncadd [#allocation3], 4294966272 }
  0x23   :  { %658 = dma.done.wait [#allocation5], 5120  }
  0x24   :  { %659 = vsyncadd [#allocation5], 4294962176  ;;  %v699_v0 = vld [vmem:[#allocation6 + $0x80] sm:$0xff]  ;;  %v701_v1 = vld [vmem:[#allocation6 + $0x88] sm:$0xff]  ;;  %vm496_vm0 = vcmask 1041409   ;;  %vm505_vm1 = vcmask 1041408  }
  0x25   :  { %v703_v2 = vld [vmem:[#allocation6 + $0x90] sm:$0xff]  ;;  %v705_v3 = vld [vmem:[#allocation6 + $0x98] sm:$0xff]  ;;  %v166_v4 = vmul.f32 %v699_v0, %v699_v0  ;;  %v167_v5 = vmul.f32 %v701_v1, %v701_v1  ;;  %v713_v7 = vld [vmem:[#allocation6] sm:$0xff]  ;;  %vm559_vm3 = vcmask 1024  }
  0x26   :  { %v168_v6 = vmul.f32 %v703_v2, %v703_v2  ;;  %v715_v8 = vld [vmem:[#allocation6 + $0x8] sm:$0xff]  ;;  %v169_v9 = vmul.f32 %v705_v3, %v705_v3  ;;  %v719_v10 = vld [vmem:[#allocation6 + $0x10] sm:$0xff]  ;;  %v721_v11 = vld [vmem:[#allocation6 + $0x18] sm:$0xff]  ;;  %v150_v12 = vmul.f32 %v713_v7, %v713_v7 }
  0x27   :  { %v151_v13 = vmul.f32 %v715_v8, %v715_v8  ;;  %v727_v14 = vld [vmem:[#allocation6 + $0xa0] sm:$0xff]  ;;  %v202_v15 = vadd.f32 %v167_v5, %v166_v4  ;;  %v152_v16 = vmul.f32 %v719_v10, %v719_v10  ;;  %v153_v17 = vmul.f32 %v721_v11, %v721_v11  ;;  %v733_v18 = vld [vmem:[#allocation6 + $0xa8] sm:$0xff]  ;;  %v735_v19 = vld [vmem:[#allocation6 + $0xb0] sm:$0xff] }
  0x28   :  { %v737_v20 = vld [vmem:[#allocation6 + $0xb8] sm:$0xff]  ;;  %v170_v21 = vmul.f32 %v727_v14, %v727_v14  ;;  %v171_v23 = vmul.f32 %v733_v18, %v733_v18  ;;  %v172_v24 = vmul.f32 %v735_v19, %v735_v19  ;;  %v747_v26 = vld [vmem:[#allocation6 + $0x20] sm:$0xff]  ;;  %v749_v27 = vld [vmem:[#allocation6 + $0x28] sm:$0xff] }
  0x29   :  { %v182_v22 = vadd.f32 %v151_v13, %v150_v12  ;;  %v173_v25 = vmul.f32 %v737_v20, %v737_v20  ;;  %v751_v28 = vld [vmem:[#allocation6 + $0x30] sm:$0xff]  ;;  %v203_v29 = vadd.f32 %v202_v15, %v168_v6  ;;  %v753_v30 = vld [vmem:[#allocation6 + $0x38] sm:$0xff]  ;;  %v154_v31 = vmul.f32 %v747_v26, %v747_v26  ;;  %v761_v34 = vld [vmem:[#allocation6 + $0xc0] sm:$0xff] }
  0x2a   :  { %v155_v32 = vmul.f32 %v749_v27, %v749_v27  ;;  %v156_v33 = vmul.f32 %v751_v28, %v751_v28  ;;  %v763_v35 = vld [vmem:[#allocation6 + $0xc8] sm:$0xff]  ;;  %v207_v37 = vadd.f32 %v171_v23, %v170_v21  ;;  %v157_v38 = vmul.f32 %v753_v30, %v753_v30  ;;  %v767_v39 = vld [vmem:[#allocation6 + $0xd0] sm:$0xff]  ;;  %v769_v40 = vld [vmem:[#allocation6 + $0xd8] sm:$0xff] }
  0x2b   :  { %v183_v36 = vadd.f32 %v182_v22, %v152_v16  ;;  %v174_v41 = vmul.f32 %v761_v34, %v761_v34  ;;  %v773_v42 = vld [vmem:[#allocation6 + $0x40] sm:$0xff]  ;;  %v204_v43 = vadd.f32 %v203_v29, %v169_v9  ;;  %v175_v45 = vmul.f32 %v763_v35, %v763_v35  ;;  %v779_v47 = vld [vmem:[#allocation6 + $0x48] sm:$0xff]  ;;  %v781_v48 = vld [vmem:[#allocation6 + $0x50] sm:$0xff] }
  0x2c   :  { %v187_v44 = vadd.f32 %v155_v32, %v154_v31  ;;  %v176_v46 = vmul.f32 %v767_v39, %v767_v39  ;;  %v783_v49 = vld [vmem:[#allocation6 + $0x58] sm:$0xff]  ;;  %v208_v51 = vadd.f32 %v207_v37, %v172_v24  ;;  %v177_v52 = vmul.f32 %v769_v40, %v769_v40  ;;  %v789_v54 = vld [vmem:[#allocation6 + $0xe0] sm:$0xff]  ;;  %v791_v55 = vld [vmem:[#allocation6 + $0xe8] sm:$0xff] }
  0x2d   :  { %v184_v50 = vadd.f32 %v183_v36, %v153_v17  ;;  %v158_v53 = vmul.f32 %v773_v42, %v773_v42  ;;  %v793_v56 = vld [vmem:[#allocation6 + $0xf0] sm:$0xff]  ;;  %205 = vadd.xlane.f32.xlu1 %v204_v43  ;;  %v212_v58 = vadd.f32 %v175_v45, %v174_v41  ;;  %v159_v59 = vmul.f32 %v779_v47, %v779_v47  ;;  %v799_v61 = vld [vmem:[#allocation6 + $0xf8] sm:$0xff]  ;;  %v801_v62 = vld [vmem:[#allocation6 + $0x60] sm:$0xff] }
  0x2e   :  { %v188_v57 = vadd.f32 %v187_v44, %v156_v33  ;;  %v160_v60 = vmul.f32 %v781_v48, %v781_v48  ;;  %v803_v63 = vld [vmem:[#allocation6 + $0x68] sm:$0xff]  ;;  %v209_v4 = vadd.f32 %v208_v51, %v173_v25  ;;  %v161_v5 = vmul.f32 %v783_v49, %v783_v49  ;;  %v811_v12 = vld [vmem:[#allocation6 + $0x70] sm:$0xff]  ;;  %v813_v13 = vld [vmem:[#allocation6 + $0x78] sm:$0xff] }
  0x2f   :  { %185 = vadd.xlane.f32.xlu0 %v184_v50  ;;  %v178_v6 = vmul.f32 %v789_v54, %v789_v54  ;;  %v179_v9 = vmul.f32 %v791_v55, %v791_v55  ;;  %v213_v16 = vadd.f32 %v212_v58, %v176_v46  ;;  %v192_v17 = vadd.f32 %v159_v59, %v158_v53  ;;  %v817_v22 = vld [vmem:[#allocation2 + $0x20] sm:$0xff]  ;;  %v819_v23 = vld [vmem:[#allocation2 + $0x28] sm:$0xff]  ;;  %v827_v32 = vld [vmem:[#allocation2 + $0x30] sm:$0xff] }
  0x30   :  { %v189_v15 = vadd.f32 %v188_v57, %v157_v38  ;;  %v180_v21 = vmul.f32 %v793_v56, %v793_v56  ;;  %v181_v24 = vmul.f32 %v799_v61, %v799_v61  ;;  %v162_v29 = vmul.f32 %v801_v62, %v801_v62  ;;  %v829_v33 = vld [vmem:[#allocation2 + $0x38] sm:$0xff]  ;;  %v831_v36 = vld [vmem:[#allocation2] sm:$0xff]  ;;  %v837_v44 = vld [vmem:[#allocation2 + $0x8] sm:$0xff] }
  0x31   :  { %v217_v25 = vadd.f32 %v179_v9, %v178_v6  ;;  %v163_v31 = vmul.f32 %v803_v63, %v803_v63  ;;  %210 = vadd.xlane.f32.xlu1 %v209_v4  ;;  %v214_v37 = vadd.f32 %v213_v16, %v177_v52  ;;  %v193_v38 = vadd.f32 %v192_v17, %v160_v60  ;;  %v839_v45 = vld [vmem:[#allocation2 + $0x10] sm:$0xff]  ;;  %v845_v53 = vld [vmem:[#allocation2 + $0x18] sm:$0xff]  ;;  %v847_v57 = vld [vmem:[#allocation4 + $0x20] sm:$0xff] }
  0x32   :  { %v164_v41 = vmul.f32 %v811_v12, %v811_v12  ;;  %v165_v43 = vmul.f32 %v813_v13, %v813_v13  ;;  %1055 = vst [vmem:[#allocation9_spill] sm:$0xff] %v837_v44  ;;  %1056 = vst [vmem:[#allocation10_spill] sm:$0xff] %v839_v45  ;;  %v110_v51 = vmul.f32 %v817_v22, %v817_v22  ;;  %v849_v58 = vld [vmem:[#allocation4 + $0x28] sm:$0xff]  ;;  %v857_v9 = vld [vmem:[#allocation4 + $0x30] sm:$0xff] }
  0x33   :  { %190 = vadd.xlane.f32.xlu0 %v189_v15  ;;  %v218_v46 = vadd.f32 %v217_v25, %v180_v21  ;;  %v197_v50 = vadd.f32 %v163_v31, %v162_v29  ;;  %v111_v52 = vmul.f32 %v819_v23, %v819_v23  ;;  %1057 = vst [vmem:[#allocation11_spill] sm:$0xff] %v845_v53  ;;  %1058 = vst [vmem:[#allocation12_spill] sm:$0xff] %v847_v57  ;;  %v861_v25 = vld [vmem:[#allocation4] sm:$0xff] }
  0x34   :  { %1059 = vst [vmem:[#allocation13_spill] sm:$0xff] %v849_v58  ;;  %v194_v59 = vadd.f32 %v193_v38, %v161_v5  ;;  %v112_v60 = vmul.f32 %v827_v32, %v827_v32  ;;  %v113_v4 = vmul.f32 %v829_v33, %v829_v33  ;;  %v106_v6 = vmul.f32 %v831_v36, %v831_v36  ;;  %v863_v5 = vld [vmem:[#allocation4 + $0x8] sm:$0xff] }
  0x35   :  { %v219_v15 = vadd.f32 %v218_v46, %v181_v24  ;;  %v198_v16 = vadd.f32 %v197_v50, %v164_v41  ;;  %v119_v17 = vadd.f32 %v111_v52, %v110_v51  ;;  %v107_v21 = vmul.f32 %v837_v44, %v837_v44  ;;  %215 = vadd.xlane.f32.xlu1 %v214_v37  ;;  %v873_v41 = vld [vmem:[#allocation4 + $0x10] sm:$0xff]  ;;  %v875_v52 = vld [vmem:[#allocation4 + $0x38] sm:$0xff] }
  0x36   :  { %v108_v29 = vmul.f32 %v839_v45, %v839_v45  ;;  %v109_v31 = vmul.f32 %v845_v53, %v845_v53  ;;  %v132_v38 = vmul.f32 %v847_v57, %v847_v57  ;;  %v133_v24 = vmul.f32 %v849_v58, %v849_v58  ;;  %v879_v44 = vld [vmem:[#allocation4 + $0x18] sm:$0xff] }
  0x37   :  { %195 = vadd.xlane.f32.xlu0 %v194_v59  ;;  %v199_v46 = vadd.f32 %v198_v16, %v165_v43  ;;  %v120_v50 = vadd.f32 %v119_v17, %v112_v60  ;;  %v114_v51 = vadd.f32 %v107_v21, %v106_v6  ;;  %v134_v37 = vmul.f32 %v857_v9, %v857_v9 }
  0x38   :  { %v141_v45 = vadd.f32 %v133_v24, %v132_v38  ;;  %v128_v57 = vmul.f32 %v861_v25, %v861_v25  ;;  %v129_v58 = vmul.f32 %v863_v5, %v863_v5  ;;  %v130_v43 = vmul.f32 %v873_v41, %v873_v41 }
  0x39   :  { %v115_v53 = vadd.f32 %v114_v51, %v108_v29  ;;  %220 = vadd.xlane.f32.xlu1 %v219_v15  ;;  %v121_v59 = vadd.f32 %v120_v50, %v113_v4  ;;  %v135_v60 = vmul.f32 %v875_v52, %v875_v52  ;;  %v131_v21 = vmul.f32 %v879_v44, %v879_v44 }
  0x3a   :  { %v142_v6 = vadd.f32 %v141_v45, %v134_v37  ;;  %v136_v16 = vadd.f32 %v129_v58, %v128_v57 }
  0x3b   :  { %200 = vadd.xlane.f32.xlu0 %v199_v46  ;;  %v116_v17 = vadd.f32 %v115_v53, %v109_v31 }
  0x3c   :  { %v137_v38 = vadd.f32 %v136_v16, %v130_v43  ;;  %v143_v24 = vadd.f32 %v142_v6, %v135_v60 }
  0x3d   :  { %122 = vadd.xlane.f32.xlu1 %v121_v59 }
  0x3e   :  { %v138_v29 = vadd.f32 %v137_v38, %v131_v21 }
  0x3f   :  { %117 = vadd.xlane.f32.xlu0 %v116_v17 }
  0x41   :  { %144 = vadd.xlane.f32.xlu1 %v143_v24 }
  0x43   :  { %139 = vadd.xlane.f32.xlu0 %v138_v29 }
  0xb6   :  { %v206_v51 = vpop.xlane.xlu1 %205 }
  0xb7   :  { %v226_v15 = vadd.f32 1e-12, %v206_v51 }
  0xb8   :  { %v186_v4 = vpop.xlane.xlu0 %185 }
  0xb9   :  { %v222_v50 = vadd.f32 1e-12, %v186_v4  ;;  %572 = vrsqrt.f32 %v226_v15 }
  0xba   :  { %v211_v45 = vpop.xlane.xlu1 %210 }
  0xbb   :  { %574 = vrsqrt.f32 %v222_v50  ;;  %v227_v57 = vadd.f32 1e-12, %v211_v45 }
  0xbc   :  { %v191_v58 = vpop.xlane.xlu0 %190 }
  0xbd   :  { %v223_v53 = vadd.f32 1e-12, %v191_v58  ;;  %576 = vrsqrt.f32 %v227_v57 }
  0xbe   :  { %v216_v31 = vpop.xlane.xlu1 %215 }
  0xbf   :  { %578 = vrsqrt.f32 %v223_v53  ;;  %v228_v46 = vadd.f32 1e-12, %v216_v31 }
  0xc0   :  { %v196_v37 = vpop.xlane.xlu0 %195 }
  0xc1   :  { %v224_v43 = vadd.f32 1e-12, %v196_v37  ;;  %580 = vrsqrt.f32 %v228_v46 }
  0xc2   :  { %v221_v59 = vpop.xlane.xlu1 %220 }
  0xc3   :  { %582 = vrsqrt.f32 %v224_v43  ;;  %v229_v60 = vadd.f32 1e-12, %v221_v59 }
  0xc4   :  { %v201_v6 = vpop.xlane.xlu0 %200 }
  0xc5   :  { %v225_v16 = vadd.f32 1e-12, %v201_v6  ;;  %584 = vrsqrt.f32 %v229_v60 }
  0xc6   :  { %v573_v17 = vpop.eup %572  ;;  %v123_v21 = vpop.xlane.xlu1 %122 }
  0xc7   :  { %586 = vrsqrt.f32 %v225_v16  ;;  %v125_v24 = vadd.f32 1e-12, %v123_v21  ;;  %v383_v15 = vmul.f32 %v573_v17, %v699_v0  ;;  %v384_v4 = vmul.f32 %v573_v17, %v701_v1 }
  0xc8   :  { %v575_v38 = vpop.eup %574  ;;  %v118_v29 = vpop.xlane.xlu0 %117  ;;  %v385_v57 = vmul.f32 %v573_v17, %v703_v2  ;;  %v386_v37 = vmul.f32 %v573_v17, %v705_v3 }
  0xc9   :  { %v124_v51 = vadd.f32 1e-12, %v118_v29  ;;  %588 = vrsqrt.f32 %v125_v24  ;;  %v367_v50 = vmul.f32 %v575_v38, %v713_v7  ;;  %v368_v45 = vmul.f32 %v575_v38, %v715_v8 }
  0xca   :  { %v577_v58 = vpop.eup %576  ;;  %v145_v53 = vpop.xlane.xlu1 %144  ;;  %v369_v31 = vmul.f32 %v575_v38, %v719_v10  ;;  %v370_v46 = vmul.f32 %v575_v38, %v721_v11 }
  0xcb   :  { %590 = vrsqrt.f32 %v124_v51  ;;  %v147_v0 = vadd.f32 1e-12, %v145_v53  ;;  %v387_v1 = vmul.f32 %v577_v58, %v727_v14  ;;  %v388_v7 = vmul.f32 %v577_v58, %v733_v18 }
  0xcc   :  { %v579_v43 = vpop.eup %578  ;;  %v140_v59 = vpop.xlane.xlu0 %139  ;;  %v389_v8 = vmul.f32 %v577_v58, %v735_v19  ;;  %v390_v3 = vmul.f32 %v577_v58, %v737_v20 }
  0xcd   :  { %v146_v60 = vadd.f32 1e-12, %v140_v59  ;;  %v371_v2 = vmul.f32 %v579_v43, %v747_v26  ;;  %v372_v6 = vmul.f32 %v579_v43, %v749_v27  ;;  %v373_v10 = vmul.f32 %v579_v43, %v751_v28 }
  0xce   :  { %592 = vrsqrt.f32 %v147_v0  ;;  %v374_v11 = vmul.f32 %v579_v43, %v753_v30  ;;  %v435_v16 = vadd.f32 %v387_v1, %v383_v15  ;;  %v581_v17 = vpop.eup %580 }
  0xcf   :  { %594 = vrsqrt.f32 %v146_v60  ;;  %v399_v14 = vadd.f32 %v371_v2, %v367_v50  ;;  %v408_v21 = vadd.f32 %v372_v6, %v368_v45  ;;  %v417_v18 = vadd.f32 %v373_v10, %v369_v31  ;;  %v1060_v60 = vld [vmem:[#allocation9_spill] sm:$0xff]  ;;  %v1061_v6 = vld [vmem:[#allocation10_spill] sm:$0xff] }
  0xd0   :  { %v583_v38 = vpop.eup %582  ;;  %v391_v19 = vmul.f32 %v581_v17, %v761_v34  ;;  %v392_v26 = vmul.f32 %v581_v17, %v763_v35  ;;  %v393_v27 = vmul.f32 %v581_v17, %v767_v39  ;;  %v394_v28 = vmul.f32 %v581_v17, %v769_v40 }
  0xd1   :  { %v375_v24 = vmul.f32 %v583_v38, %v773_v42  ;;  %v376_v30 = vmul.f32 %v583_v38, %v779_v47  ;;  %v377_v20 = vmul.f32 %v583_v38, %v781_v48  ;;  %v378_v29 = vmul.f32 %v583_v38, %v783_v49 }
  0xd2   :  { %v426_v51 = vadd.f32 %v374_v11, %v370_v46  ;;  %v436_v15 = vadd.f32 %v435_v16, %v391_v19  ;;  %v444_v50 = vadd.f32 %v388_v7, %v384_v4  ;;  %v453_v45 = vadd.f32 %v389_v8, %v385_v57  ;;  %v585_v58 = vpop.eup %584  ;;  %v1062_v11 = vld [vmem:[#allocation11_spill] sm:$0xff] }
  0xd3   :  { %v400_v34 = vadd.f32 %v399_v14, %v375_v24  ;;  %v409_v53 = vadd.f32 %v408_v21, %v376_v30  ;;  %v418_v35 = vadd.f32 %v417_v18, %v377_v20  ;;  %v462_v31 = vadd.f32 %v390_v3, %v386_v37 }
  0xd4   :  { %v587_v39 = vpop.eup %586  ;;  %v395_v40 = vmul.f32 %v585_v58, %v789_v54  ;;  %v917_v42 = vmul.f32 %v585_v58, %v791_v55  ;;  %v920_v47 = vmul.f32 %v585_v58, %v793_v56  ;;  %v923_v48 = vmul.f32 %v585_v58, %v799_v61 }
  0xd5   :  { %v379_v49 = vmul.f32 %v587_v39, %v801_v62  ;;  %v380_v4 = vmul.f32 %v587_v39, %v803_v63  ;;  %v381_v57 = vmul.f32 %v587_v39, %v811_v12  ;;  %v929_v46 = vmul.f32 %v587_v39, %v813_v13 }
  0xd6   :  { %v931_v37 = vadd.f32 %v426_v51, %v378_v29  ;;  %v933_v54 = vadd.f32 %v436_v15, %v395_v40  ;;  %v935_v55 = vadd.f32 %v444_v50, %v392_v26  ;;  %v937_v56 = vadd.f32 %v453_v45, %v393_v27  ;;  %v589_v43 = vpop.eup %588 }
  0xd7   :  { %v939_v61 = vadd.f32 %v400_v34, %v379_v49  ;;  %v941_v0 = vadd.f32 %v409_v53, %v380_v4  ;;  %v943_v62 = vadd.f32 %v418_v35, %v381_v57  ;;  %v945_v63 = vadd.f32 %v462_v31, %v394_v28 }
  0xd8   :  { %v591_v12 = vpop.eup %590  ;;  %v242_v13 = vmul.f32 %v589_v43, %v817_v22  ;;  %v243_v59 = vmul.f32 %v589_v43, %v819_v23  ;;  %v244_v1 = vmul.f32 %v589_v43, %v827_v32  ;;  %v245_v7 = vmul.f32 %v589_v43, %v829_v33 }
  0xd9   :  { %v238_v8 = vmul.f32 %v591_v12, %v831_v36  ;;  %v239_v2 = vmul.f32 %v591_v12, %v1060_v60  ;;  %v240_v10 = vmul.f32 %v591_v12, %v1061_v6  ;;  %v241_v3 = vmul.f32 %v591_v12, %v1062_v11 }
  0xda   :  { %v270_v16 = vrot.slane %v242_v13, 4  ;;  %v276_v17 = vrot.slane %v243_v59, 4  ;;  %v282_v14 = vrot.slane %v244_v1, 4  ;;  %v288_v21 = vrot.slane %v245_v7, 4 }
  0xdb   :  { %v955_v18 = vpop.eup %592  ;;  %v246_v22 = vrot.slane %v238_v8, 4  ;;  %v252_v23 = vrot.slane %v239_v2, 4  ;;  %v258_v38 = vrot.slane %v240_v10, 4  ;;  %v264_v32 = vrot.slane %v241_v3, 4 }
  0xdc   :  { %v957_v19 = vpop.eup %594  ;;  %v271_v33 = vadd.f32 %v270_v16, %v242_v13  ;;  %v277_v36 = vadd.f32 %v276_v17, %v243_v59  ;;  %v283_v26 = vadd.f32 %v282_v14, %v244_v1  ;;  %v289_v27 = vadd.f32 %v288_v21, %v245_v7 }
  0xdd   :  { %v247_v28 = vadd.f32 %v246_v22, %v238_v8  ;;  %v253_v24 = vadd.f32 %v252_v23, %v239_v2  ;;  %v259_v30 = vadd.f32 %v258_v38, %v240_v10  ;;  %v265_v20 = vadd.f32 %v264_v32, %v241_v3 }
  0xde   :  { %v272_v29 = vrot.slane %v271_v33, 2  ;;  %v278_v51 = vrot.slane %v277_v36, 2  ;;  %v284_v15 = vrot.slane %v283_v26, 2  ;;  %v290_v50 = vrot.slane %v289_v27, 2 }
  0xdf   :  { %v248_v45 = vrot.slane %v247_v28, 2  ;;  %v254_v58 = vrot.slane %v253_v24, 2  ;;  %v260_v34 = vrot.slane %v259_v30, 2  ;;  %v266_v53 = vrot.slane %v265_v20, 2 }
  0xe0   :  { %v273_v35 = vadd.f32 %v272_v29, %v271_v33  ;;  %v279_v31 = vadd.f32 %v278_v51, %v277_v36  ;;  %v285_v39 = vadd.f32 %v284_v15, %v283_v26  ;;  %v291_v40 = vadd.f32 %v290_v50, %v289_v27 }
  0xe1   :  { %v249_v49 = vadd.f32 %v248_v45, %v247_v28  ;;  %v255_v4 = vadd.f32 %v254_v58, %v253_v24  ;;  %v261_v57 = vadd.f32 %v260_v34, %v259_v30  ;;  %v267_v43 = vadd.f32 %v266_v53, %v265_v20 }
  0xe2   :  { %v274_v12 = vrot.slane %v273_v35, 1  ;;  %v280_v13 = vrot.slane %v279_v31, 1  ;;  %v286_v59 = vrot.slane %v285_v39, 1  ;;  %v292_v1 = vrot.slane %v291_v40, 1 }
  0xe3   :  { %v250_v7 = vrot.slane %v249_v49, 1  ;;  %v256_v8 = vrot.slane %v255_v4, 1  ;;  %v262_v60 = vrot.slane %v261_v57, 1  ;;  %v268_v2 = vrot.slane %v267_v43, 1 }
  0xe4   :  { %v275_v6 = vadd.f32 %v274_v12, %v273_v35  ;;  %v281_v10 = vadd.f32 %v280_v13, %v279_v31  ;;  %v287_v11 = vadd.f32 %v286_v59, %v285_v39  ;;  %v293_v3 = vadd.f32 %v292_v1, %v291_v40 }
  0xe5   :  { %v251_v16 = vadd.f32 %v250_v7, %v249_v49  ;;  %v257_v17 = vadd.f32 %v256_v8, %v255_v4  ;;  %v263_v14 = vadd.f32 %v262_v60, %v261_v57  ;;  %v269_v21 = vadd.f32 %v268_v2, %v267_v43 }
  0xe6   :  { %v959_v22 = vmul.f32 0.125, %v275_v6  ;;  %v961_v23 = vmul.f32 0.125, %v281_v10  ;;  %v963_v38 = vmul.f32 0.125, %v287_v11  ;;  %v965_v32 = vmul.f32 0.125, %v293_v3 }
  0xe7   :  { %v967_v33 = vmul.f32 0.125, %v251_v16  ;;  %v969_v36 = vmul.f32 0.125, %v257_v17  ;;  %v971_v26 = vmul.f32 0.125, %v263_v14  ;;  %v973_v27 = vmul.f32 0.125, %v269_v21 }
  0xe8   :  { %v402_v28 = vrot.slane %v939_v61, 4  ;;  %v411_v24 = vrot.slane %v941_v0, 4  ;;  %v420_v30 = vrot.slane %v943_v62, 4  ;;  %v428_v20 = vadd.f32 %v931_v37, %v929_v46 }
  0xe9   :  { %v438_v29 = vrot.slane %v933_v54, 4  ;;  %v446_v51 = vadd.f32 %v935_v55, %v917_v42  ;;  %v455_v15 = vadd.f32 %v937_v56, %v920_v47  ;;  %v464_v50 = vadd.f32 %v945_v63, %v923_v48 }
  0xea   :  { %v403_v45 = vadd.f32 %v402_v28, %v939_v61  ;;  %v412_v58 = vadd.f32 %v411_v24, %v941_v0  ;;  %v421_v34 = vadd.f32 %v420_v30, %v943_v62  ;;  %v429_v53 = vrot.slane %v428_v20, 4 }
  0xeb   :  { %v439_v46 = vadd.f32 %v438_v29, %v933_v54  ;;  %v447_v37 = vrot.slane %v446_v51, 4  ;;  %v456_v35 = vrot.slane %v455_v15, 4  ;;  %v465_v31 = vrot.slane %v464_v50, 4 }
  0xec   :  { %v404_v39 = vrot.slane %v403_v45, 2  ;;  %v413_v42 = vrot.slane %v412_v58, 2  ;;  %v422_v55 = vrot.slane %v421_v34, 2  ;;  %v430_v40 = vadd.f32 %v429_v53, %v428_v20 }
  0xed   :  { %v440_v47 = vrot.slane %v439_v46, 2  ;;  %v448_v56 = vadd.f32 %v447_v37, %v446_v51  ;;  %v457_v49 = vadd.f32 %v456_v35, %v455_v15  ;;  %v466_v48 = vadd.f32 %v465_v31, %v464_v50 }
  0xee   :  { %v405_v63 = vadd.f32 %v404_v39, %v403_v45  ;;  %v414_v61 = vadd.f32 %v413_v42, %v412_v58  ;;  %v423_v4 = vadd.f32 %v422_v55, %v421_v34  ;;  %v431_v0 = vrot.slane %v430_v40, 2 }
  0xef   :  { %v441_v62 = vadd.f32 %v440_v47, %v439_v46  ;;  %v449_v57 = vrot.slane %v448_v56, 2  ;;  %v458_v43 = vrot.slane %v457_v49, 2  ;;  %v467_v54 = vrot.slane %v466_v48, 2 }
  0xf0   :  { %v406_v12 = vrot.slane %v405_v63, 1  ;;  %v415_v13 = vrot.slane %v414_v61, 1  ;;  %v424_v59 = vrot.slane %v423_v4, 1  ;;  %v432_v1 = vadd.f32 %v431_v0, %v430_v40 }
  0xf1   :  { %v442_v7 = vrot.slane %v441_v62, 1  ;;  %v450_v8 = vadd.f32 %v449_v57, %v448_v56  ;;  %v459_v60 = vadd.f32 %v458_v43, %v457_v49  ;;  %v468_v2 = vadd.f32 %v467_v54, %v466_v48 }
  0xf2   :  { %v407_v6 = vadd.f32 %v406_v12, %v405_v63  ;;  %v416_v10 = vadd.f32 %v415_v13, %v414_v61  ;;  %v425_v11 = vadd.f32 %v424_v59, %v423_v4  ;;  %v433_v3 = vrot.slane %v432_v1, 1 }
  0xf3   :  { %v443_v16 = vadd.f32 %v442_v7, %v441_v62  ;;  %v451_v17 = vrot.slane %v450_v8, 1  ;;  %v460_v14 = vrot.slane %v459_v60, 1  ;;  %v469_v21 = vrot.slane %v468_v2, 1 }
  0xf4   :  { %v434_v28 = vadd.f32 %v433_v3, %v432_v1  ;;  %v472_v24 = vmul.f32 0.03125, %v407_v6  ;;  %v473_v30 = vmul.f32 0.03125, %v416_v10  ;;  %v474_v20 = vmul.f32 0.03125, %v425_v11 }
  0xf5   :  { %v452_v29 = vadd.f32 %v451_v17, %v450_v8  ;;  %v461_v51 = vadd.f32 %v460_v14, %v459_v60  ;;  %v470_v15 = vadd.f32 %v469_v21, %v468_v2  ;;  %v476_v50 = vmul.f32 0.03125, %v443_v16 }
  0xf6   :  { %v475_v45 = vmul.f32 0.03125, %v434_v28  ;;  %v515_v58 = vmul.f32 %v472_v24, %v967_v33  ;;  %v516_v34 = vmul.f32 %v473_v30, %v969_v36  ;;  %v517_v53 = vmul.f32 %v474_v20, %v971_v26 }
  0xf7   :  { %v477_v46 = vmul.f32 0.03125, %v452_v29  ;;  %v478_v37 = vmul.f32 0.03125, %v461_v51  ;;  %v479_v35 = vmul.f32 0.03125, %v470_v15  ;;  %v519_v31 = vmul.f32 %v476_v50, %v959_v22 }
  0xf8   :  { %v518_v39 = vmul.f32 %v475_v45, %v973_v27  ;;  %v303_v42 = vmul.f32 %v957_v19, %v861_v25  ;;  %v304_v55 = vmul.f32 %v957_v19, %v863_v5  ;;  %v305_v40 = vmul.f32 %v957_v19, %v873_v41  ;;  %v1063_v25 = vld [vmem:[#allocation12_spill] sm:$0xff]  ;;  %v1064_v5 = vld [vmem:[#allocation13_spill] sm:$0xff] }
  0xf9   :  { %v520_v47 = vmul.f32 %v477_v46, %v961_v23  ;;  %v521_v56 = vmul.f32 %v478_v37, %v963_v38  ;;  %v522_v49 = vmul.f32 %v479_v35, %v965_v32  ;;  %v531_v48 = vsel %vm496_vm0, %v519_v31, %v515_v58 }
  0xfa   :  { %v539_v63 = vsel %vm505_vm1, %v531_v48, 0.0  ;;  %v306_v61 = vmul.f32 %v957_v19, %v879_v44  ;;  %v307_v4 = vmul.f32 %v955_v18, %v1063_v25  ;;  %v308_v0 = vmul.f32 %v955_v18, %v1064_v5 }
  0xfb   :  { %v532_v41 = vsel %vm496_vm0, %v520_v47, %v516_v34  ;;  %v533_v62 = vsel %vm496_vm0, %v521_v56, %v517_v53  ;;  %v534_v57 = vsel %vm496_vm0, %v522_v49, %v518_v39  ;;  %v309_v43 = vmul.f32 %v955_v18, %v857_v9 }
  0xfc   :  { %v540_v54 = vsel %vm505_vm1, %v532_v41, 0.0  ;;  %v542_v12 = vsel %vm505_vm1, %v533_v62, 0.0  ;;  %v544_v44 = vsel %vm505_vm1, %v534_v57, 0.0  ;;  %v310_v19 = vmul.f32 %v955_v18, %v875_v52 }
  0xfd   :  { %v541_v13 = vadd.f32 %v540_v54, %v539_v63  ;;  %v311_v59 = vrot.slane %v303_v42, 4  ;;  %v317_v1 = vrot.slane %v304_v55, 4  ;;  %v323_v7 = vrot.slane %v305_v40, 4 }
  0xfe   :  { %v329_v8 = vrot.slane %v306_v61, 4  ;;  %v335_v60 = vrot.slane %v307_v4, 4  ;;  %v341_v2 = vrot.slane %v308_v0, 4  ;;  %v347_v6 = vrot.slane %v309_v43, 4 }
  0xff   :  { %v543_v10 = vadd.f32 %v542_v12, %v541_v13  ;;  %v312_v11 = vadd.f32 %v311_v59, %v303_v42  ;;  %v318_v9 = vadd.f32 %v317_v1, %v304_v55  ;;  %v324_v3 = vadd.f32 %v323_v7, %v305_v40 }
 0x100   :  { %v330_v16 = vadd.f32 %v329_v8, %v306_v61  ;;  %v336_v17 = vadd.f32 %v335_v60, %v307_v4  ;;  %v342_v14 = vadd.f32 %v341_v2, %v308_v0  ;;  %v348_v21 = vadd.f32 %v347_v6, %v309_v43 }
 0x101   :  { %v545_v28 = vadd.f32 %v544_v44, %v543_v10  ;;  %v313_v24 = vrot.slane %v312_v11, 2  ;;  %v319_v30 = vrot.slane %v318_v9, 2  ;;  %v325_v52 = vrot.slane %v324_v3, 2 }
 0x102   :  { %v331_v18 = vrot.slane %v330_v16, 2  ;;  %v337_v20 = vrot.slane %v336_v17, 2  ;;  %v343_v29 = vrot.slane %v342_v14, 2  ;;  %v349_v51 = vrot.slane %v348_v21, 2 }
 0x103   :  { %546 = vadd.xlane.f32.xlu1 %v545_v28  ;;  %v314_v15 = vadd.f32 %v313_v24, %v312_v11  ;;  %v320_v50 = vadd.f32 %v319_v30, %v318_v9  ;;  %v326_v45 = vadd.f32 %v325_v52, %v324_v3  ;;  %v353_v58 = vrot.slane %v310_v19, 4 }
 0x104   :  { %v332_v34 = vadd.f32 %v331_v18, %v330_v16  ;;  %v338_v53 = vadd.f32 %v337_v20, %v336_v17  ;;  %v344_v46 = vadd.f32 %v343_v29, %v342_v14  ;;  %v350_v37 = vadd.f32 %v349_v51, %v348_v21 }
 0x105   :  { %v315_v35 = vrot.slane %v314_v15, 1  ;;  %v321_v31 = vrot.slane %v320_v50, 1  ;;  %v327_v39 = vrot.slane %v326_v45, 1  ;;  %v354_v42 = vadd.f32 %v353_v58, %v310_v19 }
 0x106   :  { %v333_v55 = vrot.slane %v332_v34, 1  ;;  %v339_v40 = vrot.slane %v338_v53, 1  ;;  %v345_v47 = vrot.slane %v344_v46, 1  ;;  %v351_v56 = vrot.slane %v350_v37, 1 }
 0x107   :  { %v316_v49 = vadd.f32 %v315_v35, %v314_v15  ;;  %v322_v48 = vadd.f32 %v321_v31, %v320_v50  ;;  %v328_v63 = vadd.f32 %v327_v39, %v326_v45  ;;  %v355_v61 = vrot.slane %v354_v42, 2 }
 0x108   :  { %v334_v25 = vadd.f32 %v333_v55, %v332_v34  ;;  %v340_v4 = vadd.f32 %v339_v40, %v338_v53  ;;  %v346_v5 = vadd.f32 %v345_v47, %v344_v46  ;;  %v352_v0 = vadd.f32 %v351_v56, %v350_v37 }
 0x109   :  { %v356_v41 = vadd.f32 %v355_v61, %v354_v42  ;;  %v359_v62 = vmul.f32 0.125, %v316_v49  ;;  %v360_v57 = vmul.f32 0.125, %v322_v48  ;;  %v361_v43 = vmul.f32 0.125, %v328_v63 }
 0x10a   :  { %v362_v54 = vmul.f32 0.125, %v334_v25  ;;  %v363_v12 = vmul.f32 0.125, %v340_v4  ;;  %v364_v44 = vmul.f32 0.125, %v346_v5  ;;  %v365_v19 = vmul.f32 0.125, %v352_v0 }
 0x10b   :  { %v357_v13 = vrot.slane %v356_v41, 1  ;;  %v480_v59 = vmul.f32 %v359_v62, %v967_v33  ;;  %v481_v1 = vmul.f32 %v360_v57, %v969_v36  ;;  %v482_v7 = vmul.f32 %v361_v43, %v971_v26 }
 0x10c   :  { %v484_v8 = vmul.f32 %v363_v12, %v959_v22  ;;  %v485_v60 = vmul.f32 %v364_v44, %v961_v23  ;;  %v486_v2 = vmul.f32 %v365_v19, %v963_v38  ;;  %v483_v33 = vmul.f32 %v362_v54, %v973_v27  ;;  %v548_v27 = vld [vmem:[%s1045_s0] sm:$0x3] }
 0x10d   :  { %v358_v6 = vadd.f32 %v357_v13, %v356_v41  ;;  %v553_v28 = vlaneseq }
 0x10e   :  { %v497_v10 = vsel %vm496_vm0, %v484_v8, %v480_v59  ;;  %v498_v11 = vsel %vm496_vm0, %v485_v60, %v481_v1  ;;  %v499_v9 = vsel %vm496_vm0, %v486_v2, %v482_v7 }
 0x10f   :  { %v366_v3 = vmul.f32 0.125, %v358_v6  ;;  %v506_v36 = vsel %vm505_vm1, %v497_v10, 0.0  ;;  %v507_v26 = vsel %vm505_vm1, %v498_v11, 0.0  ;;  %v509_v23 = vsel %vm505_vm1, %v499_v9, 0.0 }
 0x110   :  { %v508_v16 = vadd.f32 %v507_v26, %v506_v36  ;;  %v554_v30 = vshrl.u32 %v553_v28, 7 }
 0x111   :  { %v487_v22 = vmul.f32 %v366_v3, %v965_v32 }
 0x112   :  { %v510_v38 = vadd.f32 %v509_v23, %v508_v16  ;;  %vm557_vm2 = vcmp.lt.s32.totalorder %v554_v30, 2 }
 0x113   :  { %v500_v17 = vsel %vm496_vm0, %v487_v22, %v483_v33 }
 0x114   :  { %v511_v14 = vsel %vm505_vm1, %v500_v17, 0.0 }
 0x115   :  { %v512_v21 = vadd.f32 %v511_v14, %v510_v38 }
 0x117   :  { %513 = vadd.xlane.f32.xlu0 %v512_v21 }
 0x18c   :  { %v547_v24 = vpop.xlane.xlu1 %546 }
 0x1a0   :  { %v514_v52 = vpop.xlane.xlu0 %513 }
 0x1a1   :  { %v549_v18 = vsub.f32 %v547_v24, %v514_v52 }
 0x1a3   :  { %v550_v20 = vadd.f32 %v549_v18, %v548_v27 }
 0x1a5   :  { %v551_v32 = vmax.f32 %v550_v20, 0.0 }
 0x1a7   :  { %v558_v29 = vsel %vm557_vm2, %v551_v32, 0.0 }
 0x1a8   :  { %560 = vst.msk [vmem:[%s1049_s4] sm:$0x3] %vm559_vm3, %v558_v29 }
 0x1a9   :  { %565 = vsyncpa [#allocation3], 1 }
 0x1aa   :  { %566 = vsyncpa [#allocation5], 1 }

</bundles_post_ra>
